<compile_context>
chip_gen: v5e
topology: v5e:2x2
jax: 0.10.0
libtpu: 0.0.40
codegen_flags: <defaults>
</compile_context>

<pallas_src>
import jax
import jax.numpy as jnp
from jax.experimental import pallas as pl
from jax.experimental.pallas import tpu as pltpu


def _dconv_kernel(x_ref, m1_ref, s1_ref, b1_ref, m2_ref, s2_ref, b2_ref,
                  o_ref):
    """Fused DConv for a block of Bt images.

    x_ref : (Bt, H, W*Cin)     bf16  channels-last rows, (w, ci) on lanes
    m1_ref: (3*W*Cin, W*Cout)  bf16  kh-stacked row-Toeplitz conv1 weights
    s1_ref: (1, W*Cout)        f32   folded BN1 scale, tiled over w
    b1_ref: (1, W*Cout)        f32   folded BN1 shift (includes conv1 bias)
    m2_ref: (3*W*Cout, W*Cout) bf16  kh-stacked row-Toeplitz conv2 weights
    s2_ref, b2_ref: (1, W*Cout) f32
    o_ref : (Bt, H, W*Cout)    bf16  lane-dense output rows
    """
    Bt, H, _ = x_ref.shape
    WCo = o_ref.shape[2]

    def conv3x3(x, m_ref):
        # x: (Bt, H, WC) bf16.  H zero-padding is applied per image on the
        # bf16 LHS; the 3 kh taps are folded into one contraction of depth
        # 3*WC -> a single MXU matmul per conv.
        WC = x.shape[2]
        z = jnp.zeros((Bt, 1, WC), x.dtype)
        up = jnp.concatenate([z, x[:, :H - 1, :]], axis=1)   # x[h-1]
        dn = jnp.concatenate([x[:, 1:, :], z], axis=1)       # x[h+1]
        lhs = jnp.concatenate([up, x, dn], axis=-1).reshape(Bt * H, 3 * WC)
        return jnp.dot(lhs, m_ref[...], preferred_element_type=jnp.float32)

    # Stage 1: conv -> (DropBlock = identity at eval) -> BN -> ReLU
    y = conv3x3(x_ref[...], m1_ref)                          # (Bt*H, WCo) f32
    y = jnp.maximum(y * s1_ref[...] + b1_ref[...], 0.0)

    # Stage 2: intermediate never leaves VMEM.
    y = conv3x3(y.reshape(Bt, H, WCo).astype(m2_ref.dtype), m2_ref)
    o_ref[...] = (jnp.maximum(y * s2_ref[...] + b2_ref[...], 0.0)
                  .reshape(Bt, H, WCo).astype(o_ref.dtype))


def _row_toeplitz(w, W):
    """torch-layout (Cout, Cin, 3, 3) conv weight -> (3, W*Cin, W*Cout).

    mats[kh][w_in*Cin + ci, w_out*Cout + co] = w[co, ci, kh, w_in - w_out + 1]
    (zero outside |w_in - w_out| <= 1): the W-direction 3-tap conv with its
    zero padding folded into the matmul RHS.
    """
    Cout, Cin = w.shape[0], w.shape[1]
    taps = jnp.transpose(w, (2, 3, 1, 0))            # (kh, kw, Cin, Cout)
    mats = []
    for kh in range(3):
        m = jnp.zeros((W, Cin, W, Cout), w.dtype)
        for kw in range(3):
            d = kw - 1                                # w_in = w_out + d
            eye = jnp.eye(W, k=-d, dtype=w.dtype)     # eye[w_in, w_out]
            m = m + jnp.einsum('io,cf->icof', eye, taps[kh, kw])
        mats.append(m.reshape(W * Cin, W * Cout))
    return jnp.stack(mats, axis=0)


def _fold_bn(bias, gamma, beta, mean, var, W, eps=1e-5):
    """Fold conv bias + eval-mode BN into f32 scale/shift tiled over lanes."""
    scale = (gamma / jnp.sqrt(var + eps)).astype(jnp.float32)
    shift = ((bias - mean) * scale + beta).astype(jnp.float32)
    return jnp.tile(scale, W)[None, :], jnp.tile(shift, W)[None, :]


def prepare_dconv_params(params, W):
    """Hoisted weight prep: run ONCE per weight set, not per forward call.

    Stacks the 3 kh row-Toeplitz matrices along the contraction so the kernel
    does a single matmul per conv, and folds conv bias + eval-mode BN into a
    per-channel scale/shift.
    """
    Cin, Cout = params["w1"].shape[1], params["w1"].shape[0]
    m1 = _row_toeplitz(params["w1"], W).reshape(3 * W * Cin, W * Cout)
    m2 = _row_toeplitz(params["w2"], W).reshape(3 * W * Cout, W * Cout)
    s1, b1 = _fold_bn(params["b1"], params["g1"], params["be1"],
                      params["rm1"], params["rv1"], W)
    s2, b2 = _fold_bn(params["b2"], params["g2"], params["be2"],
                      params["rm2"], params["rv2"], W)
    return dict(m1=m1.astype(jnp.bfloat16), s1=s1, b1=b1,
                m2=m2.astype(jnp.bfloat16), s2=s2, b2=b2)


def _pick_bt(N, H, target_rows=256):
    """Largest Bt dividing N with Bt*H <= target_rows, keeping >=2 grid steps.

    target_rows ~ 256 fills the 256-tall v6e/v7x MXU; the 128-tall v5e MXU
    already saturates at 128 rows, so a 256-row tile is merely neutral there.
    """
    best = 1
    for bt in range(1, N + 1):
        if N % bt == 0 and bt * H <= target_rows:
            best = bt
    if best == N and N >= 2:
        # Keep at least 2 grid steps (v7x has 2 TensorCores; 1 step idles one).
        for bt in range(best - 1, 0, -1):
            if N % bt == 0:
                return bt
    return best


@jax.jit
def dconv_forward(x_nchw, prep):
    """DConv forward, NCHW f32 in / NCHW bf16 out.

    `prep` must come from prepare_dconv_params (weight prep is hoisted out of
    the per-call path).
    """
    N, Cin, H, W = x_nchw.shape
    WCi = W * Cin
    WCo = prep["m1"].shape[1]
    Cout = WCo // W

    # NCHW -> (N, H, W*Cin) bf16.
    # TODO(synk): in a full network keep activations in this (N, H, W*C)
    # layout between blocks instead of transposing at every module boundary.
    x = jnp.transpose(x_nchw, (0, 2, 3, 1)).reshape(N, H, WCi)
    x = x.astype(jnp.bfloat16)

    Bt = _pick_bt(N, H)
    grid = (N // Bt,)

    flops = 2 * N * H * (3 * WCi * WCo + 3 * WCo * WCo)
    bytes_accessed = (N * H * WCi * 2 + N * H * WCo * 2
                      + (3 * WCi * WCo + 3 * WCo * WCo) * 2 + 4 * WCo * 4)

    out = pl.pallas_call(
        _dconv_kernel,
        out_shape=jax.ShapeDtypeStruct((N, H, WCo), jnp.bfloat16),
        grid_spec=pltpu.PrefetchScalarGridSpec(
            num_scalar_prefetch=0,
            grid=grid,
            in_specs=[
                pl.BlockSpec((Bt, H, WCi), lambda n: (n, 0, 0)),
                pl.BlockSpec((3 * WCi, WCo), lambda n: (0, 0)),
                pl.BlockSpec((1, WCo), lambda n: (0, 0)),
                pl.BlockSpec((1, WCo), lambda n: (0, 0)),
                pl.BlockSpec((3 * WCo, WCo), lambda n: (0, 0)),
                pl.BlockSpec((1, WCo), lambda n: (0, 0)),
                pl.BlockSpec((1, WCo), lambda n: (0, 0)),
            ],
            out_specs=pl.BlockSpec((Bt, H, WCo), lambda n: (n, 0, 0)),
        ),
        compiler_params=pltpu.CompilerParams(
            dimension_semantics=("parallel",),
            vmem_limit_bytes=32 * 1024 * 1024),
        cost_estimate=pl.CostEstimate(
            flops=flops, transcendentals=0, bytes_accessed=bytes_accessed),
    )(x, prep["m1"], prep["s1"], prep["b1"],
      prep["m2"], prep["s2"], prep["b2"])

    # (N, H, W*Cout) -> NCHW, transpose done in bf16 (half the HBM traffic).
    return jnp.transpose(out.reshape(N, H, W, Cout), (0, 3, 1, 2))


def make_dconv_params(key, in_ch, out_ch, dtype=jnp.float32):
    """Deterministic synthetic parameters matching DConv(in_ch, out_ch)."""
    ks = jax.random.split(key, 4)
    w1 = 0.1 * jax.random.normal(ks[0], (out_ch, in_ch, 3, 3), dtype)
    b1 = 0.1 * jax.random.normal(ks[1], (out_ch,), dtype)
    w2 = 0.1 * jax.random.normal(ks[2], (out_ch, out_ch, 3, 3), dtype)
    b2 = 0.1 * jax.random.normal(ks[3], (out_ch,), dtype)
    ones = jnp.ones((out_ch,), dtype)
    zeros = jnp.zeros((out_ch,), dtype)
    # BatchNorm2d defaults: gamma=1, beta=0, running_mean=0, running_var=1
    return dict(w1=w1, b1=b1, g1=ones, be1=zeros, rm1=zeros, rv1=ones,
                w2=w2, b2=b2, g2=ones, be2=zeros, rm2=zeros, rv2=ones)


def dconv_reference(x_nchw, params, eps=1e-5):
    """Pure-JAX f32 reference (eval-mode Conv+BN+ReLU twice)."""
    def stage(x, w, b, g, be, rm, rv):
        y = jax.lax.conv_general_dilated(
            x, w, window_strides=(1, 1), padding=((1, 1), (1, 1)),
            dimension_numbers=("NCHW", "OIHW", "NCHW"))
        y = y + b[None, :, None, None]
        y = (y - rm[None, :, None, None]) / jnp.sqrt(rv + eps)[None, :, None, None]
        y = y * g[None, :, None, None] + be[None, :, None, None]
        return jnp.maximum(y, 0.0)

    y = stage(x_nchw, params["w1"], params["b1"], params["g1"],
              params["be1"], params["rm1"], params["rv1"])
    return stage(y, params["w2"], params["b2"], params["g2"],
                 params["be2"], params["rm2"], params["rv2"])


if __name__ == "__main__":
    key = jax.random.PRNGKey(0)
    k_x, k_p = jax.random.split(key)

    in_ch, out_ch, H, W = 4, 8, 16, 16
    x = jax.random.normal(k_x, (2, in_ch, H, W), jnp.float32)  # NCHW
    params = make_dconv_params(k_p, in_ch, out_ch)

    # Weight prep hoisted out of the per-call path (once per weight set).
    prep = prepare_dconv_params(params, W)

    y = dconv_forward(x, prep)
    jax.block_until_ready(y)
    assert y.shape == (2, out_ch, H, W)

    # bf16 matmul inputs / bf16 output with f32 accumulation -> loose tolerance
    # vs the f32 reference.
    y_ref = dconv_reference(x, params)
    err = float(jnp.max(jnp.abs(y.astype(jnp.float32) - y_ref)))
    assert err < 5e-2, f"max abs error vs reference: {err}"
    print("KERNEL_OK")
</pallas_src>

<mosaic_0001>
module attributes {stable_mosaic.version = 11 : i64} {
  func.func @_dconv_kernel(%arg0: i32, %arg1: memref<1x16x64xbf16, #tpu.memory_space<vmem>>, %arg2: memref<192x128xbf16, #tpu.memory_space<vmem>>, %arg3: memref<1x128xf32, #tpu.memory_space<vmem>>, %arg4: memref<1x128xf32, #tpu.memory_space<vmem>>, %arg5: memref<384x128xbf16, #tpu.memory_space<vmem>>, %arg6: memref<1x128xf32, #tpu.memory_space<vmem>>, %arg7: memref<1x128xf32, #tpu.memory_space<vmem>>, %arg8: memref<1x16x128xbf16, #tpu.memory_space<vmem>>) attributes {dimension_semantics = [#tpu.dimension_semantics<parallel>], iteration_bounds = array<i64: 2>, scalar_prefetch = 0 : i64, scratch_operands = 0 : i64, tpu.core_type = #tpu.core_type<tc>, window_params = [{transform_indices = @transform_0, window_bounds = array<i64: 1, 16, 64>}, {pipeline_mode = #tpu.pipeline_mode<synchronous>, transform_indices = @transform_1, window_bounds = array<i64: 192, 128>}, {pipeline_mode = #tpu.pipeline_mode<synchronous>, transform_indices = @transform_2, window_bounds = array<i64: 1, 128>}, {pipeline_mode = #tpu.pipeline_mode<synchronous>, transform_indices = @transform_3, window_bounds = array<i64: 1, 128>}, {pipeline_mode = #tpu.pipeline_mode<synchronous>, transform_indices = @transform_4, window_bounds = array<i64: 384, 128>}, {pipeline_mode = #tpu.pipeline_mode<synchronous>, transform_indices = @transform_5, window_bounds = array<i64: 1, 128>}, {pipeline_mode = #tpu.pipeline_mode<synchronous>, transform_indices = @transform_6, window_bounds = array<i64: 1, 128>}, {transform_indices = @transform_7, window_bounds = array<i64: 1, 16, 128>}]} {
    %c0 = arith.constant 0 : index
    %c0_0 = arith.constant 0 : index
    %c0_1 = arith.constant 0 : index
    %0 = vector.load %arg1[%c0, %c0_0, %c0_1] : memref<1x16x64xbf16, #tpu.memory_space<vmem>>, vector<1x16x64xbf16>
    %cst = arith.constant 0.000000e+00 : bf16
    %1 = vector.broadcast %cst : bf16 to vector<1x1x64xbf16>
    %2 = vector.extract_strided_slice %0 {offsets = [0, 0, 0], sizes = [1, 15, 64], strides = [1, 1, 1]} : vector<1x16x64xbf16> to vector<1x15x64xbf16>
    %3 = tpu.concatenate %1, %2 in 1 : vector<1x1x64xbf16>, vector<1x15x64xbf16> -> vector<1x16x64xbf16>
    %4 = vector.extract_strided_slice %0 {offsets = [0, 1, 0], sizes = [1, 15, 64], strides = [1, 1, 1]} : vector<1x16x64xbf16> to vector<1x15x64xbf16>
    %5 = tpu.concatenate %4, %1 in 1 : vector<1x15x64xbf16>, vector<1x1x64xbf16> -> vector<1x16x64xbf16>
    %6 = tpu.concatenate %3, %0, %5 in 2 : vector<1x16x64xbf16>, vector<1x16x64xbf16>, vector<1x16x64xbf16> -> vector<1x16x192xbf16>
    %7 = vector.shape_cast %6 : vector<1x16x192xbf16> to vector<16x192xbf16>
    %c0_2 = arith.constant 0 : index
    %c0_3 = arith.constant 0 : index
    %8 = vector.load %arg2[%c0_2, %c0_3] : memref<192x128xbf16, #tpu.memory_space<vmem>>, vector<192x128xbf16>
    %cst_4 = arith.constant dense<0.000000e+00> : vector<16x128xf32>
    %9 = tpu.matmul %7, %8, %cst_4 {dimension_numbers = #tpu.dot_dimension_numbers<[1], [0], [0], [1], [0, 0, 1, 1], [], []>} : vector<16x192xbf16>, vector<192x128xbf16>, vector<16x128xf32> -> vector<16x128xf32>
    %c0_5 = arith.constant 0 : index
    %c0_6 = arith.constant 0 : index
    %10 = vector.load %arg3[%c0_5, %c0_6] : memref<1x128xf32, #tpu.memory_space<vmem>>, vector<1x128xf32>
    %11 = vector.broadcast %10 : vector<1x128xf32> to vector<16x128xf32>
    %12 = arith.mulf %9, %11 : vector<16x128xf32>
    %c0_7 = arith.constant 0 : index
    %c0_8 = arith.constant 0 : index
    %13 = vector.load %arg4[%c0_7, %c0_8] : memref<1x128xf32, #tpu.memory_space<vmem>>, vector<1x128xf32>
    %14 = vector.broadcast %13 : vector<1x128xf32> to vector<16x128xf32>
    %15 = arith.addf %12, %14 : vector<16x128xf32>
    %cst_9 = arith.constant 0.000000e+00 : f32
    %16 = vector.broadcast %cst_9 : f32 to vector<16x128xf32>
    %17 = arith.maximumf %15, %16 : vector<16x128xf32>
    %18 = vector.shape_cast %17 : vector<16x128xf32> to vector<1x16x128xf32>
    %19 = arith.truncf %18 : vector<1x16x128xf32> to vector<1x16x128xbf16>
    %cst_10 = arith.constant 0.000000e+00 : bf16
    %20 = vector.broadcast %cst_10 : bf16 to vector<1x1x128xbf16>
    %21 = vector.extract_strided_slice %19 {offsets = [0, 0, 0], sizes = [1, 15, 128], strides = [1, 1, 1]} : vector<1x16x128xbf16> to vector<1x15x128xbf16>
    %22 = tpu.concatenate %20, %21 in 1 : vector<1x1x128xbf16>, vector<1x15x128xbf16> -> vector<1x16x128xbf16>
    %23 = vector.extract_strided_slice %19 {offsets = [0, 1, 0], sizes = [1, 15, 128], strides = [1, 1, 1]} : vector<1x16x128xbf16> to vector<1x15x128xbf16>
    %24 = tpu.concatenate %23, %20 in 1 : vector<1x15x128xbf16>, vector<1x1x128xbf16> -> vector<1x16x128xbf16>
    %25 = tpu.concatenate %22, %19, %24 in 2 : vector<1x16x128xbf16>, vector<1x16x128xbf16>, vector<1x16x128xbf16> -> vector<1x16x384xbf16>
    %26 = vector.shape_cast %25 : vector<1x16x384xbf16> to vector<16x384xbf16>
    %c0_11 = arith.constant 0 : index
    %c0_12 = arith.constant 0 : index
    %27 = vector.load %arg5[%c0_11, %c0_12] : memref<384x128xbf16, #tpu.memory_space<vmem>>, vector<384x128xbf16>
    %cst_13 = arith.constant dense<0.000000e+00> : vector<16x128xf32>
    %28 = tpu.matmul %26, %27, %cst_13 {dimension_numbers = #tpu.dot_dimension_numbers<[1], [0], [0], [1], [0, 0, 1, 1], [], []>} : vector<16x384xbf16>, vector<384x128xbf16>, vector<16x128xf32> -> vector<16x128xf32>
    %c0_14 = arith.constant 0 : index
    %c0_15 = arith.constant 0 : index
    %29 = vector.load %arg6[%c0_14, %c0_15] : memref<1x128xf32, #tpu.memory_space<vmem>>, vector<1x128xf32>
    %30 = vector.broadcast %29 : vector<1x128xf32> to vector<16x128xf32>
    %31 = arith.mulf %28, %30 : vector<16x128xf32>
    %c0_16 = arith.constant 0 : index
    %c0_17 = arith.constant 0 : index
    %32 = vector.load %arg7[%c0_16, %c0_17] : memref<1x128xf32, #tpu.memory_space<vmem>>, vector<1x128xf32>
    %33 = vector.broadcast %32 : vector<1x128xf32> to vector<16x128xf32>
    %34 = arith.addf %31, %33 : vector<16x128xf32>
    %cst_18 = arith.constant 0.000000e+00 : f32
    %35 = vector.broadcast %cst_18 : f32 to vector<16x128xf32>
    %36 = arith.maximumf %34, %35 : vector<16x128xf32>
    %37 = vector.shape_cast %36 : vector<16x128xf32> to vector<1x16x128xf32>
    %38 = arith.truncf %37 : vector<1x16x128xf32> to vector<1x16x128xbf16>
    %c0_19 = arith.constant 0 : index
    %c0_20 = arith.constant 0 : index
    %c0_21 = arith.constant 0 : index
    %39 = vector.load %arg8[%c0_19, %c0_20, %c0_21] : memref<1x16x128xbf16, #tpu.memory_space<vmem>>, vector<1x16x128xbf16>
    tpu.vector_store %arg8[%c0_19, %c0_20, %c0_21], %38 {strides = array<i32>} : memref<1x16x128xbf16, #tpu.memory_space<vmem>>, vector<1x16x128xbf16>,
    return
  }
  func.func @transform_0(%arg0: i32) -> (i32, i32, i32) {
    %c0_i32 = arith.constant 0 : i32
    %c0_i32_0 = arith.constant 0 : i32
    %c0_i32_1 = arith.constant 0 : i32
    return %arg0, %c0_i32, %c0_i32_0 : i32, i32, i32
  }
  func.func @transform_1(%arg0: i32) -> (i32, i32) {
    %c0_i32 = arith.constant 0 : i32
    %c0_i32_0 = arith.constant 0 : i32
    %c0_i32_1 = arith.constant 0 : i32
    return %c0_i32, %c0_i32_0 : i32, i32
  }
  func.func @transform_2(%arg0: i32) -> (i32, i32) {
    %c0_i32 = arith.constant 0 : i32
    %c0_i32_0 = arith.constant 0 : i32
    %c0_i32_1 = arith.constant 0 : i32
    return %c0_i32, %c0_i32_0 : i32, i32
  }
  func.func @transform_3(%arg0: i32) -> (i32, i32) {
    %c0_i32 = arith.constant 0 : i32
    %c0_i32_0 = arith.constant 0 : i32
    %c0_i32_1 = arith.constant 0 : i32
    return %c0_i32, %c0_i32_0 : i32, i32
  }
  func.func @transform_4(%arg0: i32) -> (i32, i32) {
    %c0_i32 = arith.constant 0 : i32
    %c0_i32_0 = arith.constant 0 : i32
    %c0_i32_1 = arith.constant 0 : i32
    return %c0_i32, %c0_i32_0 : i32, i32
  }
  func.func @transform_5(%arg0: i32) -> (i32, i32) {
    %c0_i32 = arith.constant 0 : i32
    %c0_i32_0 = arith.constant 0 : i32
    %c0_i32_1 = arith.constant 0 : i32
    return %c0_i32, %c0_i32_0 : i32, i32
  }
  func.func @transform_6(%arg0: i32) -> (i32, i32) {
    %c0_i32 = arith.constant 0 : i32
    %c0_i32_0 = arith.constant 0 : i32
    %c0_i32_1 = arith.constant 0 : i32
    return %c0_i32, %c0_i32_0 : i32, i32
  }
  func.func @transform_7(%arg0: i32) -> (i32, i32, i32) {
    %c0_i32 = arith.constant 0 : i32
    %c0_i32_0 = arith.constant 0 : i32
    %c0_i32_1 = arith.constant 0 : i32
    return %arg0, %c0_i32, %c0_i32_0 : i32, i32, i32
  }
}

</mosaic_0001>

<bundles_post_ra>
// kernel: dconv_forward.1
= control target key start
LH: loop header
LB: loop body
LE: loop exit
PB: predicated region body
PF: predicated region fallthrough
CT: control target
= control target key end

     0   :  { %s1048_s24 = smov 0   ;;  %s1210_s0 = inlined_call_operand.vmem [shape: bf16[2,16,64], index: 0, kind: input, shape index: {}]   ;;  %s1211_s1 = inlined_call_operand.vmem [shape: bf16[192,128], index: 1, kind: input, shape index: {}]   ;;  %s1212_s2 = inlined_call_operand.vmem [shape: f32[1,128], index: 2, kind: input, shape index: {}]   ;;  %s1213_s3 = inlined_call_operand.vmem [shape: f32[1,128], index: 3, kind: input, shape index: {}]   ;;  %s1214_s4 = inlined_call_operand.vmem [shape: bf16[384,128], index: 4, kind: input, shape index: {}]   ;;  %s1215_s5 = inlined_call_operand.vmem [shape: f32[1,128], index: 5, kind: input, shape index: {}]   ;;  %s1216_s6 = inlined_call_operand.vmem [shape: f32[1,128], index: 6, kind: input, shape index: {}]   ;;  %s1217_s7 = inlined_call_operand.vmem [shape: bf16[2,16,128], index: 7, kind: output, shape index: {}]  }
   0x1 LB: > { %s782_s25 = sadd.s32 4294967295, %s1005_s24   ;;  %p786_p0 = scmp.ge.s32.totalorder %s1005_s24, 1  ;;  %s1005_s24 = sphi %s1048_s24, %s17_s24  }
   0x2   : > { %p237_p1 = scmp.lt.s32.totalorder %s1005_s24, 3 }
   0x4   : > { %p238_p2 = pnand %p786_p0, %p237_p1 }
   0x5   : > { %p269_p3 = scmp.lt.s32.totalorder (!%p238_p2), %s782_s25, 1  ;;  %s1007_s19 = smov (!%p238_p2), 64  }
   0x6   : > { %241 = sbr.rel (%p238_p2) target bundleno = 439 (0x1b7), region = 48 }
   0xb   : > { %v952_v0 = vld [vmem:[%s1211_s1 + $0x38] sm:$0xff]  ;;  %s1223_s25 = smov (!%p269_p3, %s782_s25), 1  ;;  %v951_v2 = vld [vmem:[%s1211_s1 + $0x30] sm:$0xff]  ;;  %v950_v5 = vld [vmem:[%s1211_s1 + $0x28] sm:$0xff]  ;;  %vm302_vm0 = vcmask 1047552   ;;  %vm308_vm3 = vcmask 523264  }
   0xc   : > { %v956_v1 = vld [vmem:[%s1211_s1 + $0x58] sm:$0xff]  ;;  %412 = vmatpush.bf16.msra.mxu0 %v952_v0  ;;  %v955_v3 = vld [vmem:[%s1211_s1 + $0x50] sm:$0xff]  ;;  %s942_s11 = sshll.u32 %s1223_s25, 3  ;;  %v954_v6 = vld [vmem:[%s1211_s1 + $0x48] sm:$0xff]  ;;  %vm303_vm1 = vsmask.f32 7424 }
   0xd   : > { %430 = vmatpush.bf16.msra.mxu1 %v956_v1  ;;  %s273_s14 = scalar_lea.vmem %s1210_s0, %s942_s11  ;;  %v949_v9 = vld [vmem:[%s1211_s1 + $0x20] sm:$0xff]  ;;  %vm1088_vm2 = vmand %vm302_vm0, %vm303_vm1  ;;  %v948_v14 = vld [vmem:[%s1211_s1 + $0x18] sm:$0xff]  ;;  %vm295_vm4 = vcmask 1040384   ;;  %vm296_vm5 = vsmask.f32 256  ;;  %s278_s9 = scalar_lea.vmem %s1217_s7, %s942_s11 }
   0xe   : > { %v944_v4 = vld [vmem:[%s273_s14] sm:$0xff]  ;;  %v947_v16 = vld [vmem:[%s1211_s1 + $0x10] sm:$0xff]  ;;  %v946_v17 = vld [vmem:[%s1211_s1 + $0x8] sm:$0xff] }
   0xf   : > { %306 = vrot.lane.b32.xlu0 %v944_v4, %s1007_s19  ;;  %v288_v7 = vshrl.u32 %v944_v4, 16  ;;  %v291_v8 = vshll.u32 %v944_v4, 16  ;;  %v953_v11 = vld [vmem:[%s1211_s1 + $0x40] sm:$0xff]  ;;  %v972_v19 = vld [vmem:[%s1214_s4 + $0x78] sm:$0xff]  ;;  %v971_v23 = vld [vmem:[%s1214_s4 + $0x70] sm:$0xff] }
  0x10   : > { %413 = vmatpush.bf16.msra.mxu0 %v951_v2  ;;  %v945_v18 = vld [vmem:[%s1211_s1] sm:$0xff]  ;;  %v964_v20 = vld [vmem:[%s1214_s4 + $0x38] sm:$0xff]  ;;  %681 = vmatpush.bf16.msra.mxu3 %v972_v19  ;;  %vm1119_vm6 = vmand %vm295_vm4, %vm296_vm5 }
  0x11   : > { %431 = vmatpush.bf16.msra.mxu1 %v955_v3  ;;  %v299_v10 = vrot.slane %v291_v8, 1  ;;  %v290_v21 = vrot.slane %v288_v7, 7  ;;  %v980_v22 = vld [vmem:[%s1214_s4 + $0xb8] sm:$0xff]  ;;  %667 = vmatpush.bf16.msra.mxu2 %v964_v20  ;;  %v970_v29 = vld [vmem:[%s1214_s4 + $0x68] sm:$0xff]  ;;  %v963_v30 = vld [vmem:[%s1214_s4 + $0x30] sm:$0xff] }
  0x12   : > { %v979_v31 = vld [vmem:[%s1214_s4 + $0xb0] sm:$0xff]  ;;  %v969_v32 = vld [vmem:[%s1214_s4 + $0x60] sm:$0xff]  ;;  %v962_v33 = vld [vmem:[%s1214_s4 + $0x28] sm:$0xff] }
  0x13   : > { %v300_v12 = vor.u32 %v299_v10, %v288_v7  ;;  %v293_v24 = vor.u32 %v291_v8, %v290_v21  ;;  %v978_v34 = vld [vmem:[%s1214_s4 + $0xa8] sm:$0xff]  ;;  %v968_v35 = vld [vmem:[%s1214_s4 + $0x58] sm:$0xff]  ;;  %v961_v36 = vld [vmem:[%s1214_s4 + $0x20] sm:$0xff] }
  0x14   : > { %414 = vmatpush.bf16.msra.mxu0 %v950_v5  ;;  %682 = vmatpush.bf16.msra.mxu3 %v971_v23  ;;  %v977_v37 = vld [vmem:[%s1214_s4 + $0xa0] sm:$0xff]  ;;  %v967_v38 = vld [vmem:[%s1214_s4 + $0x50] sm:$0xff]  ;;  %v960_v39 = vld [vmem:[%s1214_s4 + $0x18] sm:$0xff] }
  0x15   : > { %432 = vmatpush.bf16.msra.mxu1 %v954_v6  ;;  %v305_v15 = vsel %vm1088_vm2, %v300_v12, 0  ;;  %v298_v26 = vsel %vm1119_vm6, 0, %v293_v24  ;;  %668 = vmatpush.bf16.msra.mxu2 %v963_v30  ;;  %v976_v40 = vld [vmem:[%s1214_s4 + $0x98] sm:$0xff]  ;;  %v966_v41 = vld [vmem:[%s1214_s4 + $0x48] sm:$0xff]  ;;  %v959_v42 = vld [vmem:[%s1214_s4 + $0x10] sm:$0xff] }
  0x16   : > { %v975_v43 = vld [vmem:[%s1214_s4 + $0x90] sm:$0xff]  ;;  %v965_v44 = vld [vmem:[%s1214_s4 + $0x40] sm:$0xff]  ;;  %v958_v45 = vld [vmem:[%s1214_s4 + $0x8] sm:$0xff] }
  0x17   : > { %v974_v46 = vld [vmem:[%s1214_s4 + $0x88] sm:$0xff]  ;;  %v957_v47 = vld [vmem:[%s1214_s4] sm:$0xff] }
  0x18   : > { %415 = vmatpush.bf16.msra.mxu0 %v949_v9  ;;  %683 = vmatpush.bf16.msra.mxu3 %v970_v29  ;;  %v973_v48 = vld [vmem:[%s1214_s4 + $0x80] sm:$0xff] }
  0x19   : > { %433 = vmatpush.bf16.msra.mxu1 %v953_v11  ;;  %669 = vmatpush.bf16.msra.mxu2 %v962_v33  ;;  %v995_v50 = vld [vmem:[%s1212_s2] ss:$0 sm:$0xff] }
  0x1a   : > { %v996_v54 = vld [vmem:[%s1213_s3] ss:$0 sm:$0xff] }
  0x1b   : > { %v998_v13 = vld [vmem:[%s1216_s6] ss:$0 sm:$0xff] }
  0x1c   : > { %416 = vmatpush.bf16.msra.mxu0 %v948_v14  ;;  %843 = vmatmul.msk.bf16.vlgmr.msra.gmra.mxu1 %vm308_vm3, %v305_v15 }
  0x1d   : > { %695 = vmatpush.bf16.msrb.mxu1 %v980_v22  ;;  %684 = vmatpush.bf16.msra.mxu3 %v969_v32 }
  0x1e   : > { %670 = vmatpush.bf16.msra.mxu2 %v961_v36 }
  0x20   : > { %417 = vmatpush.bf16.msra.mxu0 %v947_v16 }
  0x21   : > { %696 = vmatpush.bf16.msrb.mxu1 %v979_v31  ;;  %685 = vmatpush.bf16.msra.mxu3 %v968_v35 }
  0x22   : > { %671 = vmatpush.bf16.msra.mxu2 %v960_v39 }
  0x24   : > { %418 = vmatpush.bf16.msra.mxu0 %v946_v17 }
  0x25   : > { %697 = vmatpush.bf16.msrb.mxu1 %v978_v34  ;;  %686 = vmatpush.bf16.msra.mxu3 %v967_v38 }
  0x26   : > { %672 = vmatpush.bf16.msra.mxu2 %v959_v42 }
  0x28   : > { %419 = vmatpush.bf16.msra.mxu0 %v945_v18  ;;  %v997_v18 = vld [vmem:[%s1215_s5] ss:$0 sm:$0xff] }
  0x29   : > { %698 = vmatpush.bf16.msrb.mxu1 %v977_v37  ;;  %687 = vmatpush.bf16.msra.mxu3 %v966_v41 }
  0x2a   : > { %673 = vmatpush.bf16.msra.mxu2 %v958_v45 }
  0x2d   : > { %699 = vmatpush.bf16.msrb.mxu1 %v976_v40  ;;  %688 = vmatpush.bf16.msra.mxu3 %v965_v44 }
  0x2e   : > { %674 = vmatpush.bf16.msra.mxu2 %v957_v47 }
  0x31   : > { %700 = vmatpush.bf16.msrb.mxu1 %v975_v43 }
  0x35   : > { %701 = vmatpush.bf16.msrb.mxu1 %v974_v46 }
  0x39   : > { %702 = vmatpush.bf16.msrb.mxu1 %v973_v48 }
  0x81   : > { %v307_v27 = vpop.permute.xlu0 %306 }
  0x82   : > { %v311_v28 = vsel %vm308_vm3, %v298_v26, %v307_v27 }
  0x83   : > { %420 = vmatmul.bf16.vlgmr.msra.gmra.mxu0 %v311_v28 }
  0x99   : > { %v435_v49 = vpop.f32.mrf.mxu1 }
  0xa1   : > { %v437_v56 = vpop.f32.mrf.mxu1 }
 0x100   : > { %v421_v51 = vpop.f32.mrf.mxu0 }
 0x101   : > { %v436_v52 = vadd.f32 %v435_v49, %v421_v51 }
 0x103   : > { %v444_v53 = vmul.f32 %v995_v50, %v436_v52 }
 0x105   : > { %v450_v55 = vadd.f32 %v996_v54, %v444_v53 }
 0x107   : > { %v452_v59 = vmax.f32 %v450_v55, 0.0 }
 0x108   : > { %v423_v57 = vpop.f32.mrf.mxu0 }
 0x109   : > { %v438_v58 = vadd.f32 %v437_v56, %v423_v57  ;;  %v454_v62 = vpack.c.bf16 %v452_v59, %v452_v59 }
 0x10b   : > { %v445_v60 = vmul.f32 %v995_v50, %v438_v58  ;;  %v458_v1 = vunpack.c.l.b16 %v454_v62 }
 0x10d   : > { %v451_v61 = vadd.f32 %v996_v54, %v445_v60 }
 0x10f   : > { %v453_v63 = vmax.f32 %v451_v61, 0.0 }
 0x111   : > { %v455_v0 = vpack.c.bf16 %v453_v63, %v453_v63 }
 0x113   : > { %v459_v2 = vunpack.c.l.b16 %v455_v0 }
 0x115   : > { %v460_v3 = vpack.c.b16 %v459_v2, %v458_v1 }
 0x117   : > { %689 = vmatmul.bf16.vlgmr.msra.gmra.mxu3 %v460_v3  ;;  %v462_v4 = vshrl.u32 %v460_v3, 16  ;;  %v465_v5 = vshll.u32 %v460_v3, 16 }
 0x119   : > { %v464_v6 = vrot.slane %v462_v4, 7  ;;  %v470_v7 = vrot.slane %v465_v5, 1 }
 0x11b   : > { %v467_v8 = vor.u32 %v465_v5, %v464_v6  ;;  %v471_v9 = vor.u32 %v470_v7, %v462_v4 }
 0x11d   : > { %v469_v10 = vsel %vm1119_vm6, 0, %v467_v8  ;;  %v473_v11 = vsel %vm1088_vm2, %v471_v9, 0 }
 0x11e   : > { %675 = vmatmul.bf16.vlgmr.msra.gmra.mxu2 %v469_v10  ;;  %703 = vmatmul.bf16.vlgmr.msrb.gmra.mxu1 %v473_v11 }
 0x19a   : > { %v690_v12 = vpop.f32.mrf.mxu3 }
 0x19b   : > { %v704_v14 = vpop.f32.mrf.mxu1 }
 0x1a1   : > { %v676_v15 = vpop.f32.mrf.mxu2 }
 0x1a2   : > { %v691_v16 = vadd.f32 %v690_v12, %v676_v15  ;;  %v692_v19 = vpop.f32.mrf.mxu3 }
 0x1a3   : > { %v706_v23 = vpop.f32.mrf.mxu1 }
 0x1a4   : > { %v705_v17 = vadd.f32 %v704_v14, %v691_v16 }
 0x1a6   : > { %v713_v21 = vmul.f32 %v997_v18, %v705_v17 }
 0x1a8   : > { %v719_v25 = vadd.f32 %v998_v13, %v713_v21 }
 0x1a9   : > { %v678_v20 = vpop.f32.mrf.mxu2 }
 0x1aa   : > { %v693_v22 = vadd.f32 %v692_v19, %v678_v20  ;;  %v721_v28 = vmax.f32 %v719_v25, 0.0 }
 0x1ac   : > { %v707_v24 = vadd.f32 %v706_v23, %v693_v22 }
 0x1ae   : > { %v714_v26 = vmul.f32 %v997_v18, %v707_v24 }
 0x1b0   : > { %v720_v27 = vadd.f32 %v998_v13, %v714_v26 }
 0x1b2   : > { %v722_v29 = vmax.f32 %v720_v27, 0.0 }
 0x1b4   : > { %v984_v30 = vpack.c.bf16 %v722_v29, %v721_v28 }
 0x1b6   : > { %985 = vst [vmem:[%s278_s9] sm:$0xff] %v984_v30  }
 0x1b7 PF: > { %s17_s24 = sadd.s32 1, %s1005_s24  }
 0x1b8   : > { %p14_p4 = scmp.ge.s32.totalorder %s17_s24, 4  }
 0x1ba   :  { %16 = sbr.rel (!%p14_p4) target bundleno = 1 (0x1), region = 78 }

</bundles_post_ra>
